<compile_context>
chip_gen: v7x
topology: tpu7x:2x2x1
jax: 0.10.0
libtpu: 0.0.40
codegen_flags: <defaults>
</compile_context>

<pallas_src>
import functools

import jax
import jax.numpy as jnp
from jax import lax
from jax.experimental import pallas as pl
from jax.experimental.pallas import tpu as pltpu

_LANE = 128      # TPU lane width; hidden dim zero-padded to a multiple of this.
_SUBLANE = 8     # sublane granularity for the batch tile.


def _mlp_kernel(x_ref, w1_ref, b1_ref, w2_ref, b2_ref, o_ref):
    # x_ref:  (TB, D)     streamed batch tile (VMEM, double-buffered)
    # w1_ref: (Hp, D)     resident fc1 weight (PyTorch layout), zero-padded on H
    # b1_ref: (Hp, 1)     resident fc1 bias column, zero-padded
    # w2_ref: (Hp, 1)     resident fc2 weight column, zero-padded
    # b2_ref: (1,)        fc2 bias, SMEM scalar
    # o_ref:  (1, 1, TB)  lane-dense output row for this batch tile
    #
    # Transposed orientation: the MXU result lands as (Hp, TB), the epilogue
    # reduction is over the sublane axis, and the (1, TB) row is lane-dense.
    h = lax.dot_general(
        w1_ref[...], x_ref[...],
        dimension_numbers=(((1,), (1,)), ((), ())),
        preferred_element_type=jnp.float32)                      # (Hp, TB) MXU
    h = jnp.maximum(h + b1_ref[...], 0.0)                        # (Hp, TB) VPU
    y = jnp.sum(h * w2_ref[...], axis=0, keepdims=True) + b2_ref[0]  # (1, TB)
    o_ref[...] = y.reshape(1, 1, -1).astype(o_ref.dtype)


@functools.partial(jax.jit, static_argnames=("block_b",))
def regression_nn_forward(x, w1, b1, w2, b2, *, block_b=8192):
    """RegressionNN forward: relu(x @ w1.T + b1) @ w2.T + b2.

    PyTorch-layout parameters:
      x: (B, D) f32, w1: (H, D), b1: (H,), w2: (1, H), b2: (1,)  ->  (B, 1) f32

    block_b: batch rows per grid step. 8192 is safe on v5e's default scoped
    VMEM; on v6e it can be raised to 16-32K, and on v7x keep it such that
    cdiv(B, block_b) >= 2 (ideally even) so both TensorCores get tiles.
    """
    B, D = x.shape
    H = w1.shape[0]

    # --- host-side layout prep (pure layout, no math change) ---------------
    hp = ((H + _LANE - 1) // _LANE) * _LANE
    w1_p = jnp.zeros((hp, D), jnp.float32).at[:H, :].set(w1)      # (Hp, D)
    b1_p = jnp.zeros((hp, 1), jnp.float32).at[:H, 0].set(b1)      # (Hp, 1)
    w2_p = jnp.zeros((hp, 1), jnp.float32).at[:H, 0].set(w2[0])   # (Hp, 1)
    b2_s = b2.reshape(1).astype(jnp.float32)                      # (1,) SMEM
    # Zero padding is exact: relu(0 + 0) * 0 contributes nothing.

    # --- batch tiling: stream x / out, keep weights VMEM-resident ----------
    tb = min(block_b, ((B + _SUBLANE - 1) // _SUBLANE) * _SUBLANE)
    tb = ((tb + _SUBLANE - 1) // _SUBLANE) * _SUBLANE             # multiple of 8
    nt = pl.cdiv(B, tb)
    # No host-side padding of x: the ragged final block (if B % tb != 0) reads
    # unspecified tail rows; those rows are independent and sliced off below.

    flops = 2 * B * D * hp + 4 * B * hp
    bytes_accessed = 4 * (B * D + hp * D + 2 * hp + 1 + nt * tb)

    out = pl.pallas_call(
        _mlp_kernel,
        out_shape=jax.ShapeDtypeStruct((nt, 1, tb), jnp.float32),
        grid_spec=pl.GridSpec(
            grid=(nt,),
            in_specs=[
                pl.BlockSpec((tb, D), lambda i: (i, 0)),          # x: streamed
                pl.BlockSpec((hp, D), lambda i: (0, 0)),          # w1: resident
                pl.BlockSpec((hp, 1), lambda i: (0, 0)),          # b1: resident
                pl.BlockSpec((hp, 1), lambda i: (0, 0)),          # w2: resident
                pl.BlockSpec(memory_space=pltpu.MemorySpace.SMEM),  # b2 scalar
            ],
            out_specs=pl.BlockSpec((1, 1, tb), lambda i: (i, 0, 0)),
        ),
        compiler_params=pltpu.CompilerParams(
            dimension_semantics=("parallel",),
            # Large batch tiles need more than v5e's 16 MiB default scoped
            # VMEM for the (Hp, TB) f32 temporaries; 48 MiB is still below
            # v7x's 64 MiB physical VMEM.
            vmem_limit_bytes=48 * 1024 * 1024,
        ),
        cost_estimate=pl.CostEstimate(
            flops=flops, transcendentals=0, bytes_accessed=bytes_accessed),
    )(x, w1_p, b1_p, w2_p, b2_s)

    # Lane-dense (nt, 1, tb) rows -> (B, 1) column expected by the module API
    # (drops any ragged-tail rows).
    return out.reshape(nt * tb, 1)[:B]


def _reference(x, w1, b1, w2, b2):
    return jnp.maximum(x @ w1.T + b1[None, :], 0.0) @ w2.T + b2[None, :]


if __name__ == "__main__":
    # Small deterministic shapes consistent with the module:
    # fc1: Linear(D, 50), fc2: Linear(50, 1); demo D=32.
    D, H = 32, 50

    key = jax.random.PRNGKey(0)
    kx, k1, kb1, k2, kb2, kx2 = jax.random.split(key, 6)

    # PyTorch parameter layouts.
    w1 = jax.random.normal(k1, (H, D), dtype=jnp.float32) * 0.1   # fc1.weight
    b1 = jax.random.normal(kb1, (H,), dtype=jnp.float32) * 0.1    # fc1.bias
    w2 = jax.random.normal(k2, (1, H), dtype=jnp.float32) * 0.1   # fc2.weight
    b2 = jax.random.normal(kb2, (1,), dtype=jnp.float32) * 0.1    # fc2.bias

    # Case 1: batch divides the tile exactly.
    B1 = 8
    x1 = jax.random.normal(kx, (B1, D), dtype=jnp.float32)
    out1 = jax.block_until_ready(regression_nn_forward(x1, w1, b1, w2, b2))
    ref1 = _reference(x1, w1, b1, w2, b2)
    assert out1.shape == (B1, 1)
    assert jnp.allclose(out1, ref1, atol=1e-5, rtol=1e-5)

    # Case 2: ragged batch (B not a multiple of the 8-row tile granularity)
    # exercising the no-host-pad path.
    B2 = 20
    x2 = jax.random.normal(kx2, (B2, D), dtype=jnp.float32)
    out2 = jax.block_until_ready(regression_nn_forward(x2, w1, b1, w2, b2))
    ref2 = _reference(x2, w1, b1, w2, b2)
    assert out2.shape == (B2, 1)
    assert jnp.allclose(out2, ref2, atol=1e-5, rtol=1e-5)

    print("KERNEL_OK")
</pallas_src>

<mosaic_0001>
module attributes {stable_mosaic.version = 11 : i64} {
  func.func @_mlp_kernel(%arg0: i32, %arg1: memref<8x32xf32, #tpu.memory_space<vmem>>, %arg2: memref<128x32xf32, #tpu.memory_space<vmem>>, %arg3: memref<128x1xf32, #tpu.memory_space<vmem>>, %arg4: memref<128x1xf32, #tpu.memory_space<vmem>>, %arg5: memref<1xf32, #tpu.memory_space<smem>>, %arg6: memref<1x1x8xf32, #tpu.memory_space<vmem>>) attributes {dimension_semantics = [#tpu.dimension_semantics<parallel>], iteration_bounds = array<i64: 1>, scalar_prefetch = 0 : i64, scratch_operands = 0 : i64, tpu.core_type = #tpu.core_type<tc>, window_params = [{transform_indices = @transform_0, window_bounds = array<i64: 8, 32>}, {pipeline_mode = #tpu.pipeline_mode<synchronous>, transform_indices = @transform_1, window_bounds = array<i64: 128, 32>}, {pipeline_mode = #tpu.pipeline_mode<synchronous>, transform_indices = @transform_2, window_bounds = array<i64: 128, 1>}, {pipeline_mode = #tpu.pipeline_mode<synchronous>, transform_indices = @transform_3, window_bounds = array<i64: 128, 1>}, {transform_indices = @transform_4, window_bounds = array<i64: 1>}, {transform_indices = @transform_5, window_bounds = array<i64: 1, 1, 8>}]} {
    %c0 = arith.constant 0 : index
    %c0_0 = arith.constant 0 : index
    %0 = vector.load %arg2[%c0, %c0_0] : memref<128x32xf32, #tpu.memory_space<vmem>>, vector<128x32xf32>
    %c0_1 = arith.constant 0 : index
    %c0_2 = arith.constant 0 : index
    %1 = vector.load %arg1[%c0_1, %c0_2] : memref<8x32xf32, #tpu.memory_space<vmem>>, vector<8x32xf32>
    %cst = arith.constant dense<0.000000e+00> : vector<128x8xf32>
    %2 = tpu.matmul %0, %1, %cst {dimension_numbers = #tpu.dot_dimension_numbers<[1], [1], [0], [0], [0, 0, 1, 0], [], []>} : vector<128x32xf32>, vector<8x32xf32>, vector<128x8xf32> -> vector<128x8xf32>
    %c0_3 = arith.constant 0 : index
    %c0_4 = arith.constant 0 : index
    %3 = vector.load %arg3[%c0_3, %c0_4] : memref<128x1xf32, #tpu.memory_space<vmem>>, vector<128x1xf32>
    %4 = vector.broadcast %3 : vector<128x1xf32> to vector<128x8xf32>
    %5 = arith.addf %2, %4 : vector<128x8xf32>
    %cst_5 = arith.constant 0.000000e+00 : f32
    %6 = vector.broadcast %cst_5 : f32 to vector<128x8xf32>
    %7 = arith.maximumf %5, %6 : vector<128x8xf32>
    %c0_6 = arith.constant 0 : index
    %c0_7 = arith.constant 0 : index
    %8 = vector.load %arg4[%c0_6, %c0_7] : memref<128x1xf32, #tpu.memory_space<vmem>>, vector<128x1xf32>
    %9 = vector.broadcast %8 : vector<128x1xf32> to vector<128x8xf32>
    %10 = arith.mulf %7, %9 : vector<128x8xf32>
    %cst_8 = arith.constant dense<0.000000e+00> : vector<8xf32>
    %11 = vector.multi_reduction <add>, %10, %cst_8 [0] : vector<128x8xf32> to vector<8xf32>
    %12 = vector.shape_cast %11 : vector<8xf32> to vector<1x8xf32>
    %c0_9 = arith.constant 0 : index
    %13 = memref.load %arg5[%c0_9] : memref<1xf32, #tpu.memory_space<smem>>
    %14 = vector.broadcast %13 : f32 to vector<1x8xf32>
    %15 = arith.addf %12, %14 : vector<1x8xf32>
    %16 = vector.shape_cast %15 : vector<1x8xf32> to vector<1x1x8xf32>
    %c0_10 = arith.constant 0 : index
    %c0_11 = arith.constant 0 : index
    %c0_12 = arith.constant 0 : index
    %17 = vector.load %arg6[%c0_10, %c0_11, %c0_12] : memref<1x1x8xf32, #tpu.memory_space<vmem>>, vector<1x1x8xf32>
    tpu.vector_store %arg6[%c0_10, %c0_11, %c0_12], %16 {strides = array<i32>} : memref<1x1x8xf32, #tpu.memory_space<vmem>>, vector<1x1x8xf32>,
    return
  }
  func.func @transform_0(%arg0: i32) -> (i32, i32) {
    %c0_i32 = arith.constant 0 : i32
    %c0_i32_0 = arith.constant 0 : i32
    return %arg0, %c0_i32 : i32, i32
  }
  func.func @transform_1(%arg0: i32) -> (i32, i32) {
    %c0_i32 = arith.constant 0 : i32
    %c0_i32_0 = arith.constant 0 : i32
    %c0_i32_1 = arith.constant 0 : i32
    return %c0_i32, %c0_i32_0 : i32, i32
  }
  func.func @transform_2(%arg0: i32) -> (i32, i32) {
    %c0_i32 = arith.constant 0 : i32
    %c0_i32_0 = arith.constant 0 : i32
    %c0_i32_1 = arith.constant 0 : i32
    return %c0_i32, %c0_i32_0 : i32, i32
  }
  func.func @transform_3(%arg0: i32) -> (i32, i32) {
    %c0_i32 = arith.constant 0 : i32
    %c0_i32_0 = arith.constant 0 : i32
    %c0_i32_1 = arith.constant 0 : i32
    return %c0_i32, %c0_i32_0 : i32, i32
  }
  func.func @transform_4(%arg0: i32) -> i32 {
    %c0_i32 = arith.constant 0 : i32
    %c0_i32_0 = arith.constant 0 : i32
    return %c0_i32 : i32
  }
  func.func @transform_5(%arg0: i32) -> (i32, i32, i32) {
    %c0_i32 = arith.constant 0 : i32
    %c0_i32_0 = arith.constant 0 : i32
    %c0_i32_1 = arith.constant 0 : i32
    return %arg0, %c0_i32, %c0_i32_0 : i32, i32, i32
  }
}

</mosaic_0001>

<bundles_post_ra>
// kernel: regression_nn_forward.1
= control target key start
LH: loop header
LB: loop body
LE: loop exit
PB: predicated region body
PF: predicated region fallthrough
CT: control target
= control target key end

     0   :  { %vm135_vm0 = vcmask 261120   ;;  %v607_v2 = vmov 0   ;;  %s849_s0 = inlined_call_operand.vmem [shape: f32[8,32], index: 0, kind: input, shape index: {}]   ;;  %s850_s1 = inlined_call_operand.vmem [shape: f32[128,32], index: 1, kind: input, shape index: {}]   ;;  %s851_s2 = inlined_call_operand.vmem [shape: f32[128,1], index: 2, kind: input, shape index: {}]   ;;  %s852_s3 = inlined_call_operand.vmem [shape: f32[128,1], index: 3, kind: input, shape index: {}]   ;;  %s853_s4 = inlined_call_operand.<no memory space> [shape: f32[1], index: 4, kind: input, shape index: {}]   ;;  %s854_s5 = inlined_call_operand.hbm [shape: f32[1,1,8], index: 5, kind: output, shape index: {}]  }
   0x1   :  { %v38_v0 = vld [vmem:[%s849_s0] sm:$0xff]  ;;  %581 = vset.pattern.permute.xlu0 %v607_v2  ;;  %v41_v4 = vld [vmem:[%s851_s2 + $0x10] sm:$0xff]  ;;  %v23_v6 = vld [vmem:[%s850_s1 + $0x8] sm:$0xff]  ;;  %582 = vset.pattern.permute.xlu1 %v607_v2 }
   0x2   :  { %v39_v1 = vld [vmem:[%s851_s2] sm:$0xff]  ;;  %551 = vmatprep.subr.msk.mxu0 %vm135_vm0, %v38_v0  ;;  %577 = vmatprep.subr.msk.mxu1 %vm135_vm0, %v38_v0  ;;  %v31_v7 = vld [vmem:[%s850_s1 + $0x48] sm:$0xff]  ;;  %v24_v9 = vld [vmem:[%s850_s1 + $0x10] sm:$0xff] }
   0x3   :  { %v22_v3 = vld [vmem:[%s850_s1] sm:$0xff]  ;;  %57 = vperm.xlu0 %581, %v39_v1   ;;  %552 = vmatpush3.xpose.msk.msra.mxu0 %vm135_vm0, %v38_v0  ;;  %v40_v8 = vld [vmem:[%s851_s2 + $0x8] sm:$0xff]  ;;  %v32_v10 = vld [vmem:[%s850_s1 + $0x50] sm:$0xff] }
   0x4   :  { %v30_v5 = vld [vmem:[%s850_s1 + $0x40] sm:$0xff]  ;;  %578 = vmatpush3.xpose.msk.msra.mxu1 %vm135_vm0, %v38_v0  ;;  %553 = vmatprep.mubr.msk.f32.mxu0 %vm135_vm0, %v22_v3  ;;  %v42_v11 = vld [vmem:[%s851_s2 + $0x18] sm:$0xff]  ;;  %v349_v17 = vld [vmem:[%s852_s3 + $0x8] sm:$0xff] }
   0x5   :  { %67 = vperm.xlu1 %582, %v41_v4   ;;  %565 = vmatprep.mubr.msk.f32.mxu1 %vm135_vm0, %v30_v5  ;;  %v25_v12 = vld [vmem:[%s850_s1 + $0x18] sm:$0xff]  ;;  %v348_v14 = vld [vmem:[%s852_s3] sm:$0xff]  ;;  %v27_v18 = vld [vmem:[%s850_s1 + $0x28] sm:$0xff] }
   0x6   :  { %554 = vmatmul.mubr.msk.f32.vlgmr.msra.gmra.mrb[0].mxu0 %vm135_vm0, %v23_v6  ;;  %v33_v13 = vld [vmem:[%s850_s1 + $0x58] sm:$0xff]  ;;  %v26_v15 = vld [vmem:[%s850_s1 + $0x20] sm:$0xff]  ;;  %v35_v19 = vld [vmem:[%s850_s1 + $0x68] sm:$0xff] }
   0x7   :  { %566 = vmatmul.mubr.msk.f32.vlgmr.msra.gmra.mrb[0].mxu1 %vm135_vm0, %v31_v7  ;;  %62 = vperm.xlu0 %581, %v40_v8   ;;  %v34_v16 = vld [vmem:[%s850_s1 + $0x60] sm:$0xff]  ;;  %v28_v21 = vld [vmem:[%s850_s1 + $0x30] sm:$0xff]  ;;  %v29_v24 = vld [vmem:[%s850_s1 + $0x38] sm:$0xff] }
   0x8   :  { %556 = vmatprep.mubr.msk.f32.mxu0 %vm135_vm0, %v24_v9  ;;  %568 = vmatprep.mubr.msk.f32.mxu1 %vm135_vm0, %v32_v10  ;;  %v43_v20 = vld [vmem:[%s851_s2 + $0x20] sm:$0xff]  ;;  %v36_v22 = vld [vmem:[%s850_s1 + $0x70] sm:$0xff]  ;;  %v37_v25 = vld [vmem:[%s850_s1 + $0x78] sm:$0xff] }
   0x9   :  { %72 = vperm.xlu1 %582, %v42_v11   ;;  %v350_v23 = vld [vmem:[%s852_s3 + $0x10] sm:$0xff]  ;;  %v44_v26 = vld [vmem:[%s851_s2 + $0x28] sm:$0xff] }
   0xa   :  { %557 = vmatmul.mubr.msk.f32.gmra.mrb[2].mxu0 %vm135_vm0, %v25_v12 }
   0xb   :  { %569 = vmatmul.mubr.msk.f32.gmra.mrb[2].mxu1 %vm135_vm0, %v33_v13  ;;  %366 = vperm.xlu0 %581, %v348_v14  }
   0xc   :  { %559 = vmatprep.mubr.msk.f32.mxu0 %vm135_vm0, %v26_v15  ;;  %571 = vmatprep.mubr.msk.f32.mxu1 %vm135_vm0, %v34_v16 }
   0xd   :  { %371 = vperm.xlu1 %582, %v349_v17  }
   0xe   :  { %560 = vmatmul.mubr.msk.f32.gmra.mrb[4].mxu0 %vm135_vm0, %v27_v18 }
   0xf   :  { %572 = vmatmul.mubr.msk.f32.gmra.mrb[4].mxu1 %vm135_vm0, %v35_v19  ;;  %77 = vperm.xlu0 %581, %v43_v20  }
  0x10   :  { %562 = vmatprep.mubr.msk.f32.mxu0 %vm135_vm0, %v28_v21  ;;  %574 = vmatprep.mubr.msk.f32.mxu1 %vm135_vm0, %v36_v22 }
  0x11   :  { %11 = vsyncpa [#allocation4], 0  ;;  %376 = vperm.xlu1 %582, %v350_v23   ;;  %v351_v27 = vld [vmem:[%s852_s3 + $0x18] sm:$0xff]  ;;  %v45_v28 = vld [vmem:[%s851_s2 + $0x30] sm:$0xff]  ;;  %vm460_vm1 = vcmask 64512   ;;  %s608_s10 = smov [#allocation3]  }
  0x12   :  { %563 = vmatmul.mubr.msk.f32.gmra.mrb[6].mxu0 %vm135_vm0, %v29_v24  ;;  %v352_v29 = vld [vmem:[%s852_s3 + $0x20] sm:$0xff]  ;;  %v46_v30 = vld [vmem:[%s851_s2 + $0x38] sm:$0xff]  ;;  %v353_v31 = vld [vmem:[%s852_s3 + $0x28] sm:$0xff]  ;;  %s509_s11 = sshll.u32 %s608_s10, 4  ;;  %vm501_vm2 = vcmask 57344   ;;  %s510_s11 = int_to_ptr.vmem [resolvable:$true] %s509_s11 }
  0x13   :  { %575 = vmatmul.mubr.msk.f32.gmra.mrb[6].mxu1 %vm135_vm0, %v37_v25  ;;  %82 = vperm.xlu0 %581, %v44_v26   ;;  %v47_v32 = vld [vmem:[%s851_s2 + $0x40] sm:$0xff]  ;;  %v354_v33 = vld [vmem:[%s852_s3 + $0x30] sm:$0xff]  ;;  %v48_v34 = vld [vmem:[%s851_s2 + $0x48] sm:$0xff]  ;;  %s583_s12 = scalar_lea.vmem %s510_s11, 16  ;;  %s587_s13 = scalar_lea.vmem %s510_s11, 32 }
  0x14   :  { %v355_v35 = vld [vmem:[%s852_s3 + $0x38] sm:$0xff]  ;;  %v49_v36 = vld [vmem:[%s851_s2 + $0x50] sm:$0xff]  ;;  %v356_v37 = vld [vmem:[%s852_s3 + $0x40] sm:$0xff]  ;;  %p584_p0 = scmp.ne.s32.totalorder %s510_s11, %s583_s12  ;;  %p588_p1 = scmp.lt.s32.totalorder %s510_s11, %s510_s11 }
  0x15   :  { %381 = vperm.xlu1 %582, %v351_v27   ;;  %v50_v38 = vld [vmem:[%s851_s2 + $0x58] sm:$0xff]  ;;  %v357_v39 = vld [vmem:[%s852_s3 + $0x48] sm:$0xff]  ;;  %v51_v40 = vld [vmem:[%s851_s2 + $0x60] sm:$0xff]  ;;  %p589_p2 = scmp.lt.s32.totalorder %s587_s13, %s583_s12 }
  0x16   :  { %v358_v41 = vld [vmem:[%s852_s3 + $0x50] sm:$0xff]  ;;  %v52_v42 = vld [vmem:[%s851_s2 + $0x68] sm:$0xff]  ;;  %v359_v43 = vld [vmem:[%s852_s3 + $0x58] sm:$0xff] }
  0x17   :  { %87 = vperm.xlu0 %581, %v45_v28   ;;  %v53_v44 = vld [vmem:[%s851_s2 + $0x70] sm:$0xff]  ;;  %v360_v45 = vld [vmem:[%s852_s3 + $0x60] sm:$0xff]  ;;  %v54_v46 = vld [vmem:[%s851_s2 + $0x78] sm:$0xff]  ;;  %p590_p3 = por %p589_p2, %p588_p1 }
  0x18   :  { %v361_v47 = vld [vmem:[%s852_s3 + $0x68] sm:$0xff]  ;;  %v362_v48 = vld [vmem:[%s852_s3 + $0x70] sm:$0xff]  ;;  %v363_v49 = vld [vmem:[%s852_s3 + $0x78] sm:$0xff] }
  0x19   :  { %386 = vperm.xlu1 %582, %v352_v29   ;;  %p591_p4 = pnand %p590_p3, %p584_p0 }
  0x1b   :  { %92 = vperm.xlu0 %581, %v46_v30  }
  0x1d   :  { %391 = vperm.xlu1 %582, %v353_v31  }
  0x1f   :  { %97 = vperm.xlu0 %581, %v47_v32  }
  0x21   :  { %396 = vperm.xlu1 %582, %v354_v33  }
  0x23   :  { %102 = vperm.xlu0 %581, %v48_v34  }
  0x25   :  { %401 = vperm.xlu1 %582, %v355_v35  }
  0x27   :  { %107 = vperm.xlu0 %581, %v49_v36  }
  0x29   :  { %406 = vperm.xlu1 %582, %v356_v37  }
  0x2b   :  { %112 = vperm.xlu0 %581, %v50_v38  }
  0x2d   :  { %411 = vperm.xlu1 %582, %v357_v39  }
  0x2f   :  { %117 = vperm.xlu0 %581, %v51_v40  }
  0x31   :  { %416 = vperm.xlu1 %582, %v358_v41  }
  0x33   :  { %122 = vperm.xlu0 %581, %v52_v42  }
  0x35   :  { %421 = vperm.xlu1 %582, %v359_v43  }
  0x37   :  { %127 = vperm.xlu0 %581, %v53_v44  }
  0x39   :  { %426 = vperm.xlu1 %582, %v360_v45  }
  0x3b   :  { %132 = vperm.xlu0 %581, %v54_v46  }
  0x3d   :  { %431 = vperm.xlu1 %582, %v361_v47  }
  0x3f   :  { %436 = vperm.xlu0 %581, %v362_v48  }
  0x41   :  { %441 = vperm.xlu1 %582, %v363_v49  }
  0x82   :  { %v58_v50 = vpop.permute.xlu0 %57 }
  0x84   :  { %v68_v51 = vpop.permute.xlu1 %67 }
  0x86   :  { %v63_v52 = vpop.permute.xlu0 %62 }
  0x88   :  { %v73_v53 = vpop.permute.xlu1 %72 }
  0x8a   :  { %v367_v54 = vpop.permute.xlu0 %366 }
  0x8c   :  { %v372_v55 = vpop.permute.xlu1 %371 }
  0x8e   :  { %v78_v56 = vpop.permute.xlu0 %77 }
  0x90   :  { %v377_v57 = vpop.permute.xlu1 %376 }
  0x92   :  { %v83_v58 = vpop.permute.xlu0 %82 }
  0x94   :  { %v382_v59 = vpop.permute.xlu1 %381 }
  0x96   :  { %v88_v60 = vpop.permute.xlu0 %87 }
  0x98   :  { %v387_v61 = vpop.permute.xlu1 %386 }
  0x9a   :  { %v93_v62 = vpop.permute.xlu0 %92 }
  0x9c   :  { %v392_v63 = vpop.permute.xlu1 %391 }
  0x9e   :  { %v98_v0 = vpop.permute.xlu0 %97 }
  0xa0   :  { %v806_v1 = vpop.permute.xlu1 %396 }
  0xa2   :  { %v103_v2 = vpop.permute.xlu0 %102 }
  0xa4   :  { %v808_v3 = vpop.permute.xlu1 %401 }
  0xa6   :  { %v108_v4 = vpop.permute.xlu0 %107 }
  0xa8   :  { %v810_v5 = vpop.permute.xlu1 %406 }
  0xaa   :  { %v113_v6 = vpop.permute.xlu0 %112 }
  0xac   :  { %v812_v7 = vpop.permute.xlu1 %411 }
  0xae   :  { %v118_v14 = vpop.permute.xlu0 %117 }
  0xb0   :  { %v417_v25 = vpop.permute.xlu1 %416 }
  0xb2   :  { %v123_v39 = vpop.permute.xlu0 %122 }
  0xd9   :  { %v555_v8 = vpop.f32.mrb[0].mxu0 }
  0xda   :  { %v567_v9 = vpop.f32.mrb[0].mxu1  ;;  %v259_v10 = vadd.f32 %v555_v8, %v63_v52  ;;  %v253_v11 = vpop.f32.mrb[1].mxu0 }
  0xdb   :  { %v293_v12 = vpop.f32.mrb[1].mxu1  ;;  %v254_v13 = vadd.f32 %v253_v11, %v58_v50  ;;  %v299_v46 = vadd.f32 %v567_v9, %v103_v2 }
  0xdc   :  { %v333_v15 = vmax.f32 %v259_v10, 0.0  ;;  %v294_v41 = vadd.f32 %v293_v12, %v98_v0 }
  0xdd   :  { %v332_v16 = vmax.f32 %v254_v13, 0.0  ;;  %v558_v17 = vpop.f32.mrb[2].mxu0  ;;  %v341_v10 = vmax.f32 %v299_v46, 0.0 }
  0xde   :  { %v570_v18 = vpop.f32.mrb[2].mxu1  ;;  %v445_v19 = vmul.f32 %v372_v55, %v333_v15  ;;  %v269_v20 = vadd.f32 %v558_v17, %v73_v53  ;;  %v263_v21 = vpop.f32.mrb[3].mxu0 }
  0xdf   :  { %v303_v22 = vpop.f32.mrb[3].mxu1  ;;  %v444_v23 = vmul.f32 %v367_v54, %v332_v16  ;;  %v264_v24 = vadd.f32 %v263_v21, %v68_v51  ;;  %v422_v55 = vpop.permute.xlu1 %421  ;;  %v309_v2 = vadd.f32 %v570_v18, %v113_v6 }
  0xe0   :  { %v462_v26 = vsel %vm460_vm1, %v445_v19, 0.0  ;;  %v335_v27 = vmax.f32 %v269_v20, 0.0  ;;  %v453_v19 = vmul.f32 %v812_v7, %v341_v10 }
  0xe1   :  { %v461_v28 = vsel %vm460_vm1, %v444_v23, 0.0  ;;  %v334_v29 = vmax.f32 %v264_v24, 0.0  ;;  %v561_v30 = vpop.f32.mrb[4].mxu0  ;;  %v343_v20 = vmax.f32 %v309_v2, 0.0 }
  0xe2   :  { %v573_v31 = vpop.f32.mrb[4].mxu1  ;;  %v463_v32 = vadd.f32 %v462_v26, %v461_v28  ;;  %v279_v33 = vadd.f32 %v561_v30, %v83_v58  ;;  %v273_v34 = vpop.f32.mrb[5].mxu0  ;;  %v447_v36 = vmul.f32 %v382_v59, %v335_v27  ;;  %v340_v58 = vmax.f32 %v294_v41, 0.0 }
  0xe3   :  { %v313_v35 = vpop.f32.mrb[5].mxu1  ;;  %v446_v37 = vmul.f32 %v377_v57, %v334_v29  ;;  %v274_v38 = vadd.f32 %v273_v34, %v78_v56  ;;  %v304_v59 = vadd.f32 %v303_v22, %v108_v4  ;;  %v427_v16 = vpop.permute.xlu1 %426  ;;  %v319_v6 = vadd.f32 %v573_v31, %v123_v39 }
  0xe4   :  { %v337_v40 = vmax.f32 %v279_v33, 0.0  ;;  %v466_v51 = vsel %vm460_vm1, %v447_v36, 0.0  ;;  %v314_v15 = vadd.f32 %v313_v35, %v118_v14  ;;  %v478_v14 = vsel %vm460_vm1, %v453_v19, 0.0 }
  0xe5   :  { %v464_v42 = vsel %vm460_vm1, %v446_v37, 0.0  ;;  %v336_v43 = vmax.f32 %v274_v38, 0.0  ;;  %v564_v44 = vpop.f32.mrb[6].mxu0  ;;  %v342_v13 = vmax.f32 %v304_v59, 0.0  ;;  %v455_v26 = vmul.f32 %v422_v55, %v343_v20 }
  0xe6   :  { %v576_v45 = vpop.f32.mrb[6].mxu1  ;;  %v465_v47 = vadd.f32 %v464_v42, %v463_v32  ;;  %v289_v48 = vadd.f32 %v564_v44, %v93_v62  ;;  %v283_v49 = vpop.f32.mrb[7].mxu0  ;;  %v449_v52 = vmul.f32 %v392_v63, %v337_v40  ;;  %v344_v22 = vmax.f32 %v314_v15, 0.0 }
  0xe7   :  { %v323_v50 = vpop.f32.mrb[7].mxu1  ;;  %v448_v53 = vmul.f32 %v387_v61, %v336_v43  ;;  %v284_v54 = vadd.f32 %v283_v49, %v88_v60  ;;  %v128_v63 = vpop.permute.xlu0 %127  ;;  %v452_v60 = vmul.f32 %v810_v5, %v340_v58  ;;  %v345_v27 = vmax.f32 %v319_v6, 0.0 }
  0xe8   :  { %v467_v56 = vadd.f32 %v466_v51, %v465_v47  ;;  %v339_v57 = vmax.f32 %v289_v48, 0.0  ;;  %v470_v62 = vsel %vm460_vm1, %v449_v52, 0.0  ;;  %v324_v23 = vadd.f32 %v323_v50, %v128_v63  ;;  %v432_v29 = vpop.permute.xlu1 %431 }
  0xe9   :  { %v468_v0 = vsel %vm460_vm1, %v448_v53, 0.0  ;;  %v338_v8 = vmax.f32 %v284_v54, 0.0  ;;  %v456_v31 = vmul.f32 %v427_v16, %v344_v22  ;;  %v482_v34 = vsel %vm460_vm1, %v455_v26, 0.0 }
  0xea   :  { %v469_v11 = vadd.f32 %v468_v0, %v467_v56  ;;  %v451_v9 = vmul.f32 %v808_v3, %v339_v57  ;;  %v476_v3 = vsel %vm460_vm1, %v452_v60, 0.0  ;;  %v346_v32 = vmax.f32 %v324_v23, 0.0 }
  0xeb   :  { %v450_v12 = vmul.f32 %v806_v1, %v338_v8  ;;  %v454_v1 = vmul.f32 %v417_v25, %v342_v13  ;;  %v133_v24 = vpop.permute.xlu0 %132  ;;  %v457_v35 = vmul.f32 %v432_v29, %v345_v27  ;;  %v484_v38 = vsel %vm460_vm1, %v456_v31, 0.0 }
  0xec   :  { %v471_v61 = vadd.f32 %v470_v62, %v469_v11  ;;  %v474_v18 = vsel %vm460_vm1, %v451_v9, 0.0  ;;  %v329_v28 = vadd.f32 %v576_v45, %v133_v24  ;;  %v442_v40 = vpop.permute.xlu1 %441  ;;  %v499_v54 = vstv %s853_s4 }
  0xed   :  { %v472_v4 = vsel %vm460_vm1, %v450_v12, 0.0  ;;  %v480_v7 = vsel %vm460_vm1, %v454_v1, 0.0  ;;  %v486_v42 = vsel %vm460_vm1, %v457_v35, 0.0 }
  0xee   :  { %v473_v17 = vadd.f32 %v472_v4, %v471_v61  ;;  %v347_v25 = vmax.f32 %v329_v28, 0.0 }
  0xef   :  { %v437_v36 = vpop.permute.xlu0 %436 }
  0xf0   :  { %v475_v21 = vadd.f32 %v474_v18, %v473_v17  ;;  %v458_v39 = vmul.f32 %v437_v36, %v346_v32  ;;  %v459_v43 = vmul.f32 %v442_v40, %v347_v25 }
  0xf2   :  { %v477_v5 = vadd.f32 %v476_v3, %v475_v21  ;;  %v488_v45 = vsel %vm460_vm1, %v458_v39, 0.0  ;;  %v490_v47 = vsel %vm460_vm1, %v459_v43, 0.0 }
  0xf4   :  { %v479_v30 = vadd.f32 %v478_v14, %v477_v5 }
  0xf6   :  { %v481_v33 = vadd.f32 %v480_v7, %v479_v30 }
  0xf8   :  { %v483_v37 = vadd.f32 %v482_v34, %v481_v33 }
  0xfa   :  { %v485_v41 = vadd.f32 %v484_v38, %v483_v37 }
  0xfc   :  { %v487_v44 = vadd.f32 %v486_v42, %v485_v41 }
  0xfe   :  { %v489_v46 = vadd.f32 %v488_v45, %v487_v44 }
 0x100   :  { %v491_v48 = vadd.f32 %v490_v47, %v489_v46 }
 0x102   :  { %v492_v49 = vrot.slane %v491_v48, 4 }
 0x104   :  { %v493_v50 = vadd.f32 %v492_v49, %v491_v48 }
 0x106   :  { %v494_v51 = vrot.slane %v493_v50, 2 }
 0x108   :  { %v495_v52 = vadd.f32 %v494_v51, %v493_v50 }
 0x10a   :  { %v496_v53 = vrot.slane %v495_v52, 1 }
 0x10c   :  { %v497_v55 = vadd.f32 %v496_v53, %v495_v52 }
 0x10e   :  { %v500_v56 = vadd.f32 %v499_v54, %v497_v55 }
 0x110   :  { %502 = vst.msk [vmem:[#allocation3] sm:$0x1] %vm501_vm2, %v500_v56 }
 0x111   :  { %594 = shalt.err (!%p591_p4)
}
 0x112   :  { %s595_s16 = scalar_lea.hbm %s854_s5, 16 }
 0x113   :  { %p596_p5 = scmp.ne.s32.totalorder %s854_s5, %s595_s16  ;;  %p599_p6 = scmp.lt.u32.totalorder %s595_s16, %s854_s5 }
 0x115   :  { %p601_p7 = pnand %p599_p6, %p596_p5 }
 0x117   :  { %604 = shalt.err (!%p601_p7)
}
 0x118   :  { %512 = dma.vmem_to_hbm [thread:$0]  %s510_s11, 16, %s854_s5, [#allocation4]  }
 0x119   :  { %605 = dma.done.wait [#allocation4], 16  }
 0x11a   :  { %606 = vsyncadd [#allocation4], 4294967280 }
 0x11b   :  { %516 = vsyncpa [#allocation4], 1 }

</bundles_post_ra>
